<compile_context>
chip_gen: v7x
topology: tpu7x:2x2x1
jax: 0.10.0
libtpu: 0.0.40
codegen_flags: <defaults>
</compile_context>

<pallas_src>
import functools

import jax
import jax.numpy as jnp
from jax.experimental import pallas as pl
from jax.experimental.pallas import tpu as pltpu

_LANE = 128


def _round_up(x, m):
    return ((x + m - 1) // m) * m


# --------------------------------------------------------------------------------------
# Parameter preparation (done once, outside the hot path)
# --------------------------------------------------------------------------------------
def init_critic_params(key, layer_num, state_shape, action_shape=0):
    """Synthetic nn.Linear-style init. Weights stored as (in_features, out_features)."""
    dims_in = [state_shape + action_shape] + [state_shape] * (layer_num + 1)
    dims_out = [state_shape] * (layer_num + 1) + [1]
    params = []
    for d_in, d_out in zip(dims_in, dims_out):
        key, kw, kb = jax.random.split(key, 3)
        bound = 1.0 / (d_in ** 0.5)
        w = jax.random.uniform(kw, (d_in, d_out), jnp.float32, -bound, bound)
        b = jax.random.uniform(kb, (d_out,), jnp.float32, -bound, bound)
        params.append((w, b))
    return params


def prepare_critic_params(params, state_dim, action_dim=0, compute_dtype=jnp.float32):
    """Pad all feature dims to 128 lanes, split the first layer for fused concat,
    fold the final (H, 1) layer into a (H, 128) lane-dense weight, pre-cast weights."""
    hidden_dim = params[0][0].shape[1]          # = state_shape
    h_pad = _round_up(hidden_dim, _LANE)
    out_pad = _LANE

    def pad_w(w, rows, cols):
        return jnp.pad(w, ((0, rows - w.shape[0]), (0, cols - w.shape[1])))

    def pad_b(b, cols):
        return jnp.pad(b.reshape(1, -1), ((0, 0), (0, cols - b.shape[0])))

    w0, b0 = params[0]
    w0_s = pad_w(w0[:state_dim], state_dim, h_pad).astype(compute_dtype)
    w0_a = None
    if action_dim > 0:
        w0_a = pad_w(w0[state_dim:state_dim + action_dim], action_dim, h_pad)
        w0_a = w0_a.astype(compute_dtype)

    hidden = []
    for w, b in params[1:-1]:
        hidden.append((pad_w(w, h_pad, h_pad).astype(compute_dtype),
                       pad_b(b, h_pad).astype(jnp.float32)))

    w_last, b_last = params[-1]
    prepared = {
        "w0_s": w0_s,
        "w0_a": w0_a,
        "b0": pad_b(b0, h_pad).astype(jnp.float32),
        "hidden": hidden,
        "w_out": pad_w(w_last, h_pad, out_pad).astype(compute_dtype),
        "b_out": pad_b(b_last, out_pad).astype(jnp.float32),
        "compute_dtype": compute_dtype,
    }
    return prepared


# --------------------------------------------------------------------------------------
# Kernel
# --------------------------------------------------------------------------------------
def _make_critic_kernel(has_action, n_hidden, compute_dtype):
    def kernel(*refs):
        idx = 0
        s = refs[idx][...]; idx += 1
        a = None
        if has_action:
            a = refs[idx][...]; idx += 1
        w0_s = refs[idx][...]; idx += 1
        if has_action:
            w0_a = refs[idx][...]; idx += 1
        b0 = refs[idx][...]; idx += 1

        # Fused concat: first Linear computed as a split matmul.
        h = jnp.dot(s, w0_s, preferred_element_type=jnp.float32)
        if has_action:
            h = h + jnp.dot(a, w0_a, preferred_element_type=jnp.float32)
        h = jnp.maximum(h + b0, 0.0)                       # bias + ReLU in f32

        for _ in range(n_hidden):
            w = refs[idx][...]
            b = refs[idx + 1][...]
            idx += 2
            h = jnp.dot(h.astype(compute_dtype), w, preferred_element_type=jnp.float32)
            h = jnp.maximum(h + b, 0.0)

        w_out = refs[idx][...]
        b_out = refs[idx + 1][...]
        out_ref = refs[-1]
        out = jnp.dot(h.astype(compute_dtype), w_out,
                      preferred_element_type=jnp.float32) + b_out
        out_ref[...] = out.astype(out_ref.dtype)           # lane-dense (TB, 128) store

    return kernel


# --------------------------------------------------------------------------------------
# Wrapper
# --------------------------------------------------------------------------------------
def critic_forward(s, prepared, a=None, *, block_batch=256):
    """Pallas-backed equivalent of Critic.forward(s, a). Returns (batch, 1) f32."""
    cd = prepared["compute_dtype"]
    has_action = prepared["w0_a"] is not None
    if has_action and a is None:
        raise ValueError("params were prepared with an action input; `a` is required")

    batch = s.shape[0]
    s2 = s.reshape(batch, -1).astype(cd)
    d_s = s2.shape[1]
    a2, d_a = None, 0
    if has_action:
        a2 = a.reshape(batch, -1).astype(cd)
        d_a = a2.shape[1]

    # Batch tile: multiple of 8 sublanes, capped by block_batch (keeps the live
    # (TB, 128) activation well inside registers / VMEM on all of v5e/v6e/v7x).
    tb = min(block_batch, _round_up(batch, 8))
    b_pad = _round_up(batch, tb)
    if b_pad != batch:
        s2 = jnp.pad(s2, ((0, b_pad - batch), (0, 0)))
        if has_action:
            a2 = jnp.pad(a2, ((0, b_pad - batch), (0, 0)))
    grid = (b_pad // tb,)

    # Assemble args: activations (batch-tiled), then weights/biases (VMEM-resident).
    args = [s2] + ([a2] if has_action else [])
    in_specs = [pl.BlockSpec((tb, d_s), lambda i: (i, 0))]
    if has_action:
        in_specs.append(pl.BlockSpec((tb, d_a), lambda i: (i, 0)))

    weight_args = [prepared["w0_s"]]
    if has_action:
        weight_args.append(prepared["w0_a"])
    weight_args.append(prepared["b0"])
    for w, b in prepared["hidden"]:
        weight_args += [w, b]
    weight_args += [prepared["w_out"], prepared["b_out"]]

    const_map = lambda i: (0, 0)  # noqa: E731  (weights resident across batch tiles)
    args += weight_args
    in_specs += [pl.BlockSpec(w.shape, const_map) for w in weight_args]

    out_pad = prepared["b_out"].shape[1]
    out_spec = pl.BlockSpec((tb, out_pad), lambda i: (i, 0))
    out_shape = jax.ShapeDtypeStruct((b_pad, out_pad), jnp.float32)

    kernel = _make_critic_kernel(has_action, len(prepared["hidden"]), cd)
    out = pl.pallas_call(
        kernel,
        grid=grid,
        in_specs=in_specs,
        out_specs=out_spec,
        out_shape=out_shape,
        compiler_params=pltpu.CompilerParams(dimension_semantics=("parallel",)),
    )(*args)
    return out[:batch, :1]


# --------------------------------------------------------------------------------------
# Pure-JAX reference
# --------------------------------------------------------------------------------------
def _critic_forward_ref(s, params, a=None):
    batch = s.shape[0]
    x = s.reshape(batch, -1).astype(jnp.float32)
    if a is not None:
        x = jnp.concatenate([x, a.reshape(batch, -1).astype(jnp.float32)], axis=1)
    n = len(params)
    for i, (w, b) in enumerate(params):
        x = x @ w + b[None, :]
        if i < n - 1:
            x = jnp.maximum(x, 0.0)
    return x


if __name__ == "__main__":
    layer_num = 2
    state_shape = 32
    action_shape = 8

    key = jax.random.PRNGKey(0)
    key, ks, ka, kp, ks2 = jax.random.split(key, 5)

    # ---- case 1: small batch with state + action (f32 compute) ----
    batch = 2
    s = jax.random.normal(ks, (batch, state_shape), jnp.float32)
    a = jax.random.normal(ka, (batch, action_shape), jnp.float32)
    params = init_critic_params(kp, layer_num, state_shape, action_shape)
    prepared = prepare_critic_params(params, state_shape, action_shape,
                                     compute_dtype=jnp.float32)

    out = jax.block_until_ready(critic_forward(s, prepared, a))
    ref = _critic_forward_ref(s, params, a)
    assert out.shape == (batch, 1), out.shape
    assert jnp.allclose(out, ref, atol=1e-5, rtol=1e-5)

    # ---- case 2: state-only path (a=None), batch not a tile multiple, grid > 1 ----
    batch2 = 130
    s_big = jax.random.normal(ks2, (batch2, state_shape), jnp.float32)
    params_s_only = init_critic_params(kp, layer_num, state_shape, 0)
    prepared_s_only = prepare_critic_params(params_s_only, state_shape, 0,
                                            compute_dtype=jnp.float32)
    out2 = jax.block_until_ready(critic_forward(s_big, prepared_s_only, block_batch=64))
    ref2 = _critic_forward_ref(s_big, params_s_only)
    assert out2.shape == (batch2, 1)
    assert jnp.allclose(out2, ref2, atol=1e-5, rtol=1e-5)

    # ---- case 3: bf16 matmul operands (v6e/v7x fast path), f32 accumulation ----
    prepared_bf16 = prepare_critic_params(params, state_shape, action_shape,
                                          compute_dtype=jnp.bfloat16)
    out3 = jax.block_until_ready(critic_forward(s, prepared_bf16, a))
    assert out3.shape == (batch, 1)
    assert jnp.allclose(out3, ref, atol=1e-1, rtol=1e-1)

    print("KERNEL_OK")
</pallas_src>

<mosaic_0001>
module attributes {stable_mosaic.version = 11 : i64} {
  func.func @kernel(%arg0: i32, %arg1: memref<8x32xf32, #tpu.memory_space<vmem>>, %arg2: memref<8x8xf32, #tpu.memory_space<vmem>>, %arg3: memref<32x128xf32, #tpu.memory_space<vmem>>, %arg4: memref<8x128xf32, #tpu.memory_space<vmem>>, %arg5: memref<1x128xf32, #tpu.memory_space<vmem>>, %arg6: memref<128x128xf32, #tpu.memory_space<vmem>>, %arg7: memref<1x128xf32, #tpu.memory_space<vmem>>, %arg8: memref<128x128xf32, #tpu.memory_space<vmem>>, %arg9: memref<1x128xf32, #tpu.memory_space<vmem>>, %arg10: memref<128x128xf32, #tpu.memory_space<vmem>>, %arg11: memref<1x128xf32, #tpu.memory_space<vmem>>, %arg12: memref<8x128xf32, #tpu.memory_space<vmem>>) attributes {dimension_semantics = [#tpu.dimension_semantics<parallel>], iteration_bounds = array<i64: 1>, scalar_prefetch = 0 : i64, scratch_operands = 0 : i64, tpu.core_type = #tpu.core_type<tc>, window_params = [{transform_indices = @transform_0, window_bounds = array<i64: 8, 32>}, {transform_indices = @transform_1, window_bounds = array<i64: 8, 8>}, {pipeline_mode = #tpu.pipeline_mode<synchronous>, transform_indices = @transform_2, window_bounds = array<i64: 32, 128>}, {pipeline_mode = #tpu.pipeline_mode<synchronous>, transform_indices = @transform_3, window_bounds = array<i64: 8, 128>}, {pipeline_mode = #tpu.pipeline_mode<synchronous>, transform_indices = @transform_4, window_bounds = array<i64: 1, 128>}, {pipeline_mode = #tpu.pipeline_mode<synchronous>, transform_indices = @transform_5, window_bounds = array<i64: 128, 128>}, {pipeline_mode = #tpu.pipeline_mode<synchronous>, transform_indices = @transform_6, window_bounds = array<i64: 1, 128>}, {pipeline_mode = #tpu.pipeline_mode<synchronous>, transform_indices = @transform_7, window_bounds = array<i64: 128, 128>}, {pipeline_mode = #tpu.pipeline_mode<synchronous>, transform_indices = @transform_8, window_bounds = array<i64: 1, 128>}, {pipeline_mode = #tpu.pipeline_mode<synchronous>, transform_indices = @transform_9, window_bounds = array<i64: 128, 128>}, {pipeline_mode = #tpu.pipeline_mode<synchronous>, transform_indices = @transform_10, window_bounds = array<i64: 1, 128>}, {transform_indices = @transform_11, window_bounds = array<i64: 8, 128>}]} {
    %c0 = arith.constant 0 : index
    %c0_0 = arith.constant 0 : index
    %0 = vector.load %arg1[%c0, %c0_0] : memref<8x32xf32, #tpu.memory_space<vmem>>, vector<8x32xf32>
    %c0_1 = arith.constant 0 : index
    %c0_2 = arith.constant 0 : index
    %1 = vector.load %arg2[%c0_1, %c0_2] : memref<8x8xf32, #tpu.memory_space<vmem>>, vector<8x8xf32>
    %c0_3 = arith.constant 0 : index
    %c0_4 = arith.constant 0 : index
    %2 = vector.load %arg3[%c0_3, %c0_4] : memref<32x128xf32, #tpu.memory_space<vmem>>, vector<32x128xf32>
    %c0_5 = arith.constant 0 : index
    %c0_6 = arith.constant 0 : index
    %3 = vector.load %arg4[%c0_5, %c0_6] : memref<8x128xf32, #tpu.memory_space<vmem>>, vector<8x128xf32>
    %c0_7 = arith.constant 0 : index
    %c0_8 = arith.constant 0 : index
    %4 = vector.load %arg5[%c0_7, %c0_8] : memref<1x128xf32, #tpu.memory_space<vmem>>, vector<1x128xf32>
    %cst = arith.constant dense<0.000000e+00> : vector<8x128xf32>
    %5 = tpu.matmul %0, %2, %cst {dimension_numbers = #tpu.dot_dimension_numbers<[1], [0], [0], [1], [0, 0, 1, 1], [], []>} : vector<8x32xf32>, vector<32x128xf32>, vector<8x128xf32> -> vector<8x128xf32>
    %cst_9 = arith.constant dense<0.000000e+00> : vector<8x128xf32>
    %6 = tpu.matmul %1, %3, %cst_9 {dimension_numbers = #tpu.dot_dimension_numbers<[1], [0], [0], [1], [0, 0, 1, 1], [], []>} : vector<8x8xf32>, vector<8x128xf32>, vector<8x128xf32> -> vector<8x128xf32>
    %7 = arith.addf %5, %6 : vector<8x128xf32>
    %8 = vector.broadcast %4 : vector<1x128xf32> to vector<8x128xf32>
    %9 = arith.addf %7, %8 : vector<8x128xf32>
    %cst_10 = arith.constant 0.000000e+00 : f32
    %10 = vector.broadcast %cst_10 : f32 to vector<8x128xf32>
    %11 = arith.maximumf %9, %10 : vector<8x128xf32>
    %c0_11 = arith.constant 0 : index
    %c0_12 = arith.constant 0 : index
    %12 = vector.load %arg6[%c0_11, %c0_12] : memref<128x128xf32, #tpu.memory_space<vmem>>, vector<128x128xf32>
    %c0_13 = arith.constant 0 : index
    %c0_14 = arith.constant 0 : index
    %13 = vector.load %arg7[%c0_13, %c0_14] : memref<1x128xf32, #tpu.memory_space<vmem>>, vector<1x128xf32>
    %cst_15 = arith.constant dense<0.000000e+00> : vector<8x128xf32>
    %14 = tpu.matmul %11, %12, %cst_15 {dimension_numbers = #tpu.dot_dimension_numbers<[1], [0], [0], [1], [0, 0, 1, 1], [], []>} : vector<8x128xf32>, vector<128x128xf32>, vector<8x128xf32> -> vector<8x128xf32>
    %15 = vector.broadcast %13 : vector<1x128xf32> to vector<8x128xf32>
    %16 = arith.addf %14, %15 : vector<8x128xf32>
    %cst_16 = arith.constant 0.000000e+00 : f32
    %17 = vector.broadcast %cst_16 : f32 to vector<8x128xf32>
    %18 = arith.maximumf %16, %17 : vector<8x128xf32>
    %c0_17 = arith.constant 0 : index
    %c0_18 = arith.constant 0 : index
    %19 = vector.load %arg8[%c0_17, %c0_18] : memref<128x128xf32, #tpu.memory_space<vmem>>, vector<128x128xf32>
    %c0_19 = arith.constant 0 : index
    %c0_20 = arith.constant 0 : index
    %20 = vector.load %arg9[%c0_19, %c0_20] : memref<1x128xf32, #tpu.memory_space<vmem>>, vector<1x128xf32>
    %cst_21 = arith.constant dense<0.000000e+00> : vector<8x128xf32>
    %21 = tpu.matmul %18, %19, %cst_21 {dimension_numbers = #tpu.dot_dimension_numbers<[1], [0], [0], [1], [0, 0, 1, 1], [], []>} : vector<8x128xf32>, vector<128x128xf32>, vector<8x128xf32> -> vector<8x128xf32>
    %22 = vector.broadcast %20 : vector<1x128xf32> to vector<8x128xf32>
    %23 = arith.addf %21, %22 : vector<8x128xf32>
    %cst_22 = arith.constant 0.000000e+00 : f32
    %24 = vector.broadcast %cst_22 : f32 to vector<8x128xf32>
    %25 = arith.maximumf %23, %24 : vector<8x128xf32>
    %c0_23 = arith.constant 0 : index
    %c0_24 = arith.constant 0 : index
    %26 = vector.load %arg10[%c0_23, %c0_24] : memref<128x128xf32, #tpu.memory_space<vmem>>, vector<128x128xf32>
    %c0_25 = arith.constant 0 : index
    %c0_26 = arith.constant 0 : index
    %27 = vector.load %arg11[%c0_25, %c0_26] : memref<1x128xf32, #tpu.memory_space<vmem>>, vector<1x128xf32>
    %cst_27 = arith.constant dense<0.000000e+00> : vector<8x128xf32>
    %28 = tpu.matmul %25, %26, %cst_27 {dimension_numbers = #tpu.dot_dimension_numbers<[1], [0], [0], [1], [0, 0, 1, 1], [], []>} : vector<8x128xf32>, vector<128x128xf32>, vector<8x128xf32> -> vector<8x128xf32>
    %29 = vector.broadcast %27 : vector<1x128xf32> to vector<8x128xf32>
    %30 = arith.addf %28, %29 : vector<8x128xf32>
    %c0_28 = arith.constant 0 : index
    %c0_29 = arith.constant 0 : index
    %31 = vector.load %arg12[%c0_28, %c0_29] : memref<8x128xf32, #tpu.memory_space<vmem>>, vector<8x128xf32>
    tpu.vector_store %arg12[%c0_28, %c0_29], %30 {strides = array<i32>} : memref<8x128xf32, #tpu.memory_space<vmem>>, vector<8x128xf32>,
    return
  }
  func.func @transform_0(%arg0: i32) -> (i32, i32) {
    %c0_i32 = arith.constant 0 : i32
    %c0_i32_0 = arith.constant 0 : i32
    return %arg0, %c0_i32 : i32, i32
  }
  func.func @transform_1(%arg0: i32) -> (i32, i32) {
    %c0_i32 = arith.constant 0 : i32
    %c0_i32_0 = arith.constant 0 : i32
    return %arg0, %c0_i32 : i32, i32
  }
  func.func @transform_2(%arg0: i32) -> (i32, i32) {
    %c0_i32 = arith.constant 0 : i32
    %c0_i32_0 = arith.constant 0 : i32
    %c0_i32_1 = arith.constant 0 : i32
    return %c0_i32, %c0_i32_0 : i32, i32
  }
  func.func @transform_3(%arg0: i32) -> (i32, i32) {
    %c0_i32 = arith.constant 0 : i32
    %c0_i32_0 = arith.constant 0 : i32
    %c0_i32_1 = arith.constant 0 : i32
    return %c0_i32, %c0_i32_0 : i32, i32
  }
  func.func @transform_4(%arg0: i32) -> (i32, i32) {
    %c0_i32 = arith.constant 0 : i32
    %c0_i32_0 = arith.constant 0 : i32
    %c0_i32_1 = arith.constant 0 : i32
    return %c0_i32, %c0_i32_0 : i32, i32
  }
  func.func @transform_5(%arg0: i32) -> (i32, i32) {
    %c0_i32 = arith.constant 0 : i32
    %c0_i32_0 = arith.constant 0 : i32
    %c0_i32_1 = arith.constant 0 : i32
    return %c0_i32, %c0_i32_0 : i32, i32
  }
  func.func @transform_6(%arg0: i32) -> (i32, i32) {
    %c0_i32 = arith.constant 0 : i32
    %c0_i32_0 = arith.constant 0 : i32
    %c0_i32_1 = arith.constant 0 : i32
    return %c0_i32, %c0_i32_0 : i32, i32
  }
  func.func @transform_7(%arg0: i32) -> (i32, i32) {
    %c0_i32 = arith.constant 0 : i32
    %c0_i32_0 = arith.constant 0 : i32
    %c0_i32_1 = arith.constant 0 : i32
    return %c0_i32, %c0_i32_0 : i32, i32
  }
  func.func @transform_8(%arg0: i32) -> (i32, i32) {
    %c0_i32 = arith.constant 0 : i32
    %c0_i32_0 = arith.constant 0 : i32
    %c0_i32_1 = arith.constant 0 : i32
    return %c0_i32, %c0_i32_0 : i32, i32
  }
  func.func @transform_9(%arg0: i32) -> (i32, i32) {
    %c0_i32 = arith.constant 0 : i32
    %c0_i32_0 = arith.constant 0 : i32
    %c0_i32_1 = arith.constant 0 : i32
    return %c0_i32, %c0_i32_0 : i32, i32
  }
  func.func @transform_10(%arg0: i32) -> (i32, i32) {
    %c0_i32 = arith.constant 0 : i32
    %c0_i32_0 = arith.constant 0 : i32
    %c0_i32_1 = arith.constant 0 : i32
    return %c0_i32, %c0_i32_0 : i32, i32
  }
  func.func @transform_11(%arg0: i32) -> (i32, i32) {
    %c0_i32 = arith.constant 0 : i32
    %c0_i32_0 = arith.constant 0 : i32
    return %arg0, %c0_i32 : i32, i32
  }
}

</mosaic_0001>

<bundles_post_ra>
// kernel: tpu_custom_call.1
= control target key start
LH: loop header
LB: loop body
LE: loop exit
PB: predicated region body
PF: predicated region fallthrough
CT: control target
= control target key end

     0   :  { %16 = vsyncpa [#allocation3], 0  ;;  %s1240_s0 = inlined_call_operand.hbm [shape: f32[8,32], index: 0, kind: input, shape index: {}]   ;;  %s1241_s1 = inlined_call_operand.hbm [shape: f32[8,8], index: 1, kind: input, shape index: {}]   ;;  %s1242_s2 = inlined_call_operand.hbm [shape: f32[32,128], index: 2, kind: input, shape index: {}]   ;;  %s1243_s3 = inlined_call_operand.vmem [shape: f32[8,128], index: 3, kind: input, shape index: {}]   ;;  %s1244_s4 = inlined_call_operand.vmem [shape: f32[1,128], index: 4, kind: input, shape index: {}]   ;;  %s1245_s5 = inlined_call_operand.hbm [shape: f32[128,128], index: 5, kind: input, shape index: {}]   ;;  %s1246_s6 = inlined_call_operand.vmem [shape: f32[1,128], index: 6, kind: input, shape index: {}]   ;;  %s1247_s7 = inlined_call_operand.hbm [shape: f32[128,128], index: 7, kind: input, shape index: {}]   ;;  %s1248_s8 = inlined_call_operand.vmem [shape: f32[1,128], index: 8, kind: input, shape index: {}]   ;;  %s1249_s9 = inlined_call_operand.hbm [shape: f32[128,128], index: 9, kind: input, shape index: {}]   ;;  %s1250_s10 = inlined_call_operand.vmem [shape: f32[1,128], index: 10, kind: input, shape index: {}]   ;;  %s1251_s11 = inlined_call_operand.hbm [shape: f32[8,128], index: 11, kind: output, shape index: {}]  }
   0x1   :  { %17 = vsyncpa [#allocation6], 0 }
   0x2   :  { %18 = vsyncpa [#allocation9], 0 }
   0x3   :  { %19 = vsyncpa [#allocation12], 0 }
   0x4   :  { %20 = vsyncpa [#allocation4], 0  ;;  %s1020_s17 = smov [#allocation5]   ;;  %s856_s21 = scalar_lea.hbm %s1241_s1, 128 }
   0x5   :  { %s37_s18 = sshll.u32 %s1020_s17, 4  ;;  %p857_p0 = scmp.ne.s32.totalorder %s1241_s1, %s856_s21  ;;  %s38_s18 = int_to_ptr.vmem [resolvable:$true] %s37_s18 }
   0x6   :  { %p860_p1 = scmp.lt.u32.totalorder %s856_s21, %s1241_s1 }
   0x8   :  { %p862_p2 = pnand %p860_p1, %p857_p0 }
   0xa   :  { %865 = shalt.err (!%p862_p2)
}
   0xb   :  { %s866_s26 = scalar_lea.vmem %s38_s18, 128  ;;  %p871_p4 = scmp.lt.s32.totalorder %s38_s18, %s38_s18 }
   0xc   :  { %p867_p3 = scmp.ne.s32.totalorder %s38_s18, %s866_s26  ;;  %p872_p5 = scmp.lt.s32.totalorder %s866_s26, %s866_s26 }
   0xe   :  { %p873_p6 = por %p872_p5, %p871_p4 }
  0x10   :  { %p874_p7 = pnand %p873_p6, %p867_p3 }
  0x12   :  { %877 = shalt.err (!%p874_p7)
}
  0x13   :  { %40 = dma.hbm_to_vmem [thread:$0]  %s1241_s1, 128, %s38_s18, [#allocation6]  }
  0x14   :  { %s1021_s29 = smov [#allocation8]   ;;  %s1022_s12 = smov [#allocation2]  }
  0x15   :  { %s62_s30 = sshll.u32 %s1021_s29, 4  ;;  %s27_s13 = sshll.u32 %s1022_s12, 4  ;;  %s63_s30 = int_to_ptr.vmem [resolvable:$true] %s62_s30  ;;  %s28_s13 = int_to_ptr.vmem [resolvable:$true] %s27_s13 }
  0x16   :  { %s878_s16 = scalar_lea.hbm %s1245_s5, 2048 }
  0x17   :  { %p879_p8 = scmp.ne.s32.totalorder %s1245_s5, %s878_s16  ;;  %p882_p9 = scmp.lt.u32.totalorder %s878_s16, %s1245_s5 }
  0x19   :  { %p884_p10 = pnand %p882_p9, %p879_p8 }
  0x1b   :  { %887 = shalt.err (!%p884_p10)
}
  0x1c   :  { %s888_s1 = scalar_lea.vmem %s63_s30, 2048  ;;  %p893_p12 = scmp.lt.s32.totalorder %s63_s30, %s63_s30 }
  0x1d   :  { %p889_p11 = scmp.ne.s32.totalorder %s63_s30, %s888_s1  ;;  %p894_p13 = scmp.lt.s32.totalorder %s888_s1, %s888_s1 }
  0x1f   :  { %p895_p0 = por %p894_p13, %p893_p12 }
  0x21   :  { %p896_p1 = pnand %p895_p0, %p889_p11 }
  0x23   :  { %899 = shalt.err (!%p896_p1)
}
  0x24   :  { %s1023_s18 = smov 128   ;;  %s1024_s22 = smov 8  }
  0x25   :  { %68 = dma.hbm_to_vmem [thread:$0]  %s1245_s5, 2048, %s63_s30, [#allocation9], %s1023_s18, %s1023_s18, %s1024_s22  }
  0x26   :  { %s900_s27 = scalar_lea.hbm %s1240_s0, 128 }
  0x27   :  { %p901_p2 = scmp.ne.s32.totalorder %s1240_s0, %s900_s27  ;;  %p904_p3 = scmp.lt.u32.totalorder %s900_s27, %s1240_s0 }
  0x29   :  { %p906_p4 = pnand %p904_p3, %p901_p2 }
  0x2b   :  { %909 = shalt.err (!%p906_p4)
}
  0x2c   :  { %s910_s15 = scalar_lea.vmem %s28_s13, 128  ;;  %p915_p6 = scmp.lt.s32.totalorder %s28_s13, %s28_s13 }
  0x2d   :  { %p911_p5 = scmp.ne.s32.totalorder %s28_s13, %s910_s15  ;;  %p916_p7 = scmp.lt.s32.totalorder %s910_s15, %s910_s15 }
  0x2f   :  { %p917_p8 = por %p916_p7, %p915_p6 }
  0x31   :  { %p918_p9 = pnand %p917_p8, %p911_p5 }
  0x33   :  { %921 = shalt.err (!%p918_p9)
}
  0x34   :  { %30 = dma.hbm_to_vmem [thread:$0]  %s1240_s0, 128, %s28_s13, [#allocation3]  }
  0x35   :  { %s1025_s16 = smov [#allocation7]   ;;  %s1026_s19 = smov [#allocation10]  }
  0x36   :  { %s46_s17 = sshll.u32 %s1025_s16, 4  ;;  %s76_s20 = sshll.u32 %s1026_s19, 4  ;;  %s47_s17 = int_to_ptr.vmem [resolvable:$true] %s46_s17  ;;  %s77_s20 = int_to_ptr.vmem [resolvable:$true] %s76_s20 }
  0x37   :  { %s922_s23 = scalar_lea.hbm %s1242_s2, 512 }
  0x38   :  { %p923_p10 = scmp.ne.s32.totalorder %s1242_s2, %s922_s23  ;;  %p926_p11 = scmp.lt.u32.totalorder %s922_s23, %s1242_s2 }
  0x3a   :  { %p928_p12 = pnand %p926_p11, %p923_p10 }
  0x3c   :  { %931 = shalt.err (!%p928_p12)
}
  0x3d   :  { %s932_s0 = scalar_lea.vmem %s47_s17, 512  ;;  %p937_p0 = scmp.lt.s32.totalorder %s47_s17, %s47_s17 }
  0x3e   :  { %p933_p13 = scmp.ne.s32.totalorder %s47_s17, %s932_s0  ;;  %p938_p1 = scmp.lt.s32.totalorder %s932_s0, %s932_s0 }
  0x40   :  { %p939_p2 = por %p938_p1, %p937_p0 }
  0x42   :  { %p940_p3 = pnand %p939_p2, %p933_p13 }
  0x44   :  { %943 = shalt.err (!%p940_p3)
}
  0x45   :  { %52 = dma.hbm_to_vmem [thread:$0]  %s1242_s2, 512, %s47_s17, [#allocation6], %s1023_s18, %s1023_s18, %s1024_s22  }
  0x46   :  { %s944_s14 = scalar_lea.hbm %s1247_s7, 2048 }
  0x47   :  { %p945_p4 = scmp.ne.s32.totalorder %s1247_s7, %s944_s14  ;;  %p948_p5 = scmp.lt.u32.totalorder %s944_s14, %s1247_s7 }
  0x49   :  { %p950_p6 = pnand %p948_p5, %p945_p4 }
  0x4b   :  { %953 = shalt.err (!%p950_p6)
}
  0x4c   :  { %s954_s19 = scalar_lea.vmem %s77_s20, 2048  ;;  %p959_p8 = scmp.lt.s32.totalorder %s77_s20, %s77_s20 }
  0x4d   :  { %p955_p7 = scmp.ne.s32.totalorder %s77_s20, %s954_s19  ;;  %p960_p9 = scmp.lt.s32.totalorder %s954_s19, %s954_s19 }
  0x4f   :  { %p961_p10 = por %p960_p9, %p959_p8 }
  0x51   :  { %p962_p11 = pnand %p961_p10, %p955_p7 }
  0x53   :  { %965 = shalt.err (!%p962_p11)
}
  0x54   :  { %82 = dma.hbm_to_vmem [thread:$0]  %s1247_s7, 2048, %s77_s20, [#allocation9], %s1023_s18, %s1023_s18, %s1024_s22  }
  0x55   :  { %s1027_s21 = smov [#allocation11]   ;;  %s966_s25 = scalar_lea.hbm %s1249_s9, 2048 }
  0x56   :  { %s90_s1 = sshll.u32 %s1027_s21, 4  ;;  %p967_p12 = scmp.ne.s32.totalorder %s1249_s9, %s966_s25  ;;  %s91_s1 = int_to_ptr.vmem [resolvable:$true] %s90_s1 }
  0x57   :  { %p970_p13 = scmp.lt.u32.totalorder %s966_s25, %s1249_s9 }
  0x59   :  { %p972_p0 = pnand %p970_p13, %p967_p12 }
  0x5b   :  { %975 = shalt.err (!%p972_p0)
}
  0x5c   :  { %s976_s28 = scalar_lea.vmem %s91_s1, 2048  ;;  %p981_p2 = scmp.lt.s32.totalorder %s91_s1, %s91_s1 }
  0x5d   :  { %p977_p1 = scmp.ne.s32.totalorder %s91_s1, %s976_s28  ;;  %p982_p3 = scmp.lt.s32.totalorder %s976_s28, %s976_s28 }
  0x5f   :  { %p983_p4 = por %p982_p3, %p981_p2 }
  0x61   :  { %p984_p5 = pnand %p983_p4, %p977_p1 }
  0x63   :  { %987 = shalt.err (!%p984_p5)
}
  0x64   :  { %96 = dma.hbm_to_vmem [thread:$0]  %s1249_s9, 2048, %s91_s1, [#allocation12], %s1023_s18, %s1023_s18, %s1024_s22  }
  0x65   :  { %1010 = dma.done.wait [#allocation3], 128  }
  0x66   :  { %1011 = vsyncadd [#allocation3], 4294967168 }
  0x67   :  { %1012 = dma.done.wait [#allocation6], 640  }
  0x68   :  { %1013 = vsyncadd [#allocation6], 4294966656 }
  0x69   :  { %1014 = dma.done.wait [#allocation9], 4096  }
  0x6a   :  { %1015 = vsyncadd [#allocation9], 4294963200 }
  0x6b   :  { %1016 = dma.done.wait [#allocation12], 2048  }
  0x6c   :  { %1017 = vsyncadd [#allocation12], 4294965248  ;;  %v1028_v0 = vmov 0.0   ;;  %vm1029_vm0 = vmmov 0   ;;  %v1030_v1 = vmov 0.0|0.0   ;;  %vm125_vm1 = vcmask 64512  }
  0x6d   :  { %645 = vmatprep.subr.mxu1 %v1028_v0  ;;  %647 = vmatprep.mubr.msk.f32.mxu1 %vm1029_vm0, %v1028_v0  ;;  %v123_v2 = vld [vmem:[%s1243_s3] sm:$0xff]  ;;  %v118_v3 = vld [vmem:[#allocation5] sm:$0xff]  ;;  %v119_v4 = vld [vmem:[#allocation7] sm:$0xff]  ;;  %vm199_vm2 = vcmask 261120   ;;  %s1031_s5 = smov [#allocation13]  }
  0x6e   :  { %772 = vmatprep.subr.bf16.mxu0 %v1030_v1  ;;  %693 = vmatprep.mubr.msk.f32.mxu0 %vm1029_vm0, %v1028_v0  ;;  %v120_v5 = vld [vmem:[#allocation7 + $0x8] sm:$0xff]  ;;  %v121_v6 = vld [vmem:[#allocation7 + $0x10] sm:$0xff]  ;;  %v122_v7 = vld [vmem:[#allocation7 + $0x18] sm:$0xff]  ;;  %s569_s30 = sshll.u32 %s1031_s5, 4  ;;  %s570_s30 = int_to_ptr.vmem [resolvable:$true] %s569_s30 }
  0x6f   :  { %646 = vmatpush3.msra.mxu1 %v123_v2  ;;  %v767_v8 = vpack.c.bf16 %v120_v5, %v119_v4  ;;  %v281_v9 = vld [vmem:[#allocation8] sm:$0xff]  ;;  %v282_v10 = vld [vmem:[#allocation8 + $0x8] sm:$0xff]  ;;  %v283_v12 = vld [vmem:[#allocation8 + $0x10] sm:$0xff]  ;;  %v770_v14 = vpack.c.bf16 %v122_v7, %v121_v6  ;;  %s988_s16 = scalar_lea.vmem %s570_s30, 128  ;;  %p993_p7 = scmp.lt.s32.totalorder %s570_s30, %s570_s30 }
  0x70   :  { %648 = vmatmul.mubr.msk.f32.vlgmr.msra.gmra.mrb[0].mxu1 %vm125_vm1, %v118_v3  ;;  %766 = vmatprep.subr.bf16.mxu1 %v1030_v1  ;;  %v773_v11 = vpack.c.bf16 %v282_v10, %v281_v9  ;;  %v284_v13 = vld [vmem:[#allocation8 + $0x18] sm:$0xff]  ;;  %v285_v16 = vld [vmem:[#allocation8 + $0x20] sm:$0xff]  ;;  %v286_v17 = vld [vmem:[#allocation8 + $0x28] sm:$0xff]  ;;  %p989_p6 = scmp.ne.s32.totalorder %s570_s30, %s988_s16  ;;  %p994_p8 = scmp.lt.s32.totalorder %s988_s16, %s988_s16 }
  0x71   :  { %658 = vmatprep.mubr.msk.f32.mxu1 %vm1029_vm0, %v1028_v0  ;;  %768 = vmatpush3.bf16.msra.mxu1 %v767_v8  ;;  %v776_v15 = vpack.c.bf16 %v284_v13, %v283_v12  ;;  %v117_v18 = vld [vmem:[#allocation2] sm:$0xff]  ;;  %v779_v19 = vpack.c.bf16 %v286_v17, %v285_v16  ;;  %v288_v21 = vld [vmem:[#allocation8 + $0x38] sm:$0xff]  ;;  %v289_v23 = vld [vmem:[#allocation8 + $0x40] sm:$0xff] }
  0x72   :  { %769 = vmatprep.subr.bf16.mxu1 %v1030_v1  ;;  %774 = vmatpush3.bf16.msra.mxu0 %v773_v11  ;;  %v287_v20 = vld [vmem:[#allocation8 + $0x30] sm:$0xff]  ;;  %v290_v24 = vld [vmem:[#allocation8 + $0x48] sm:$0xff]  ;;  %v292_v27 = vld [vmem:[#allocation8 + $0x58] sm:$0xff]  ;;  %p995_p9 = por %p994_p8, %p993_p7 }
  0x73   :  { %775 = vmatprep.subr.bf16.mxu0 %v1030_v1  ;;  %v782_v22 = vpack.c.bf16 %v288_v21, %v287_v20  ;;  %v785_v25 = vpack.c.bf16 %v290_v24, %v289_v23  ;;  %v291_v26 = vld [vmem:[#allocation8 + $0x50] sm:$0xff]  ;;  %v293_v29 = vld [vmem:[#allocation8 + $0x60] sm:$0xff]  ;;  %v294_v30 = vld [vmem:[#allocation8 + $0x68] sm:$0xff] }
  0x74   :  { %v788_v28 = vpack.c.bf16 %v292_v27, %v291_v26  ;;  %v791_v31 = vpack.c.bf16 %v294_v30, %v293_v29  ;;  %v295_v32 = vld [vmem:[#allocation8 + $0x70] sm:$0xff]  ;;  %v296_v33 = vld [vmem:[#allocation8 + $0x78] sm:$0xff]  ;;  %v375_v35 = vld [vmem:[#allocation10] sm:$0xff]  ;;  %p996_p10 = pnand %p995_p9, %p989_p6 }
  0x75   :  { %771 = vmatpush3.bf16.msra.mxu1 %v770_v14  ;;  %v794_v34 = vpack.c.bf16 %v296_v33, %v295_v32  ;;  %v376_v36 = vld [vmem:[#allocation10 + $0x8] sm:$0xff]  ;;  %v377_v37 = vld [vmem:[#allocation10 + $0x10] sm:$0xff]  ;;  %v378_v39 = vld [vmem:[#allocation10 + $0x18] sm:$0xff] }
  0x76   :  { %777 = vmatpush3.bf16.msra.mxu0 %v776_v15  ;;  %796 = vmatprep.subr.bf16.mxu1 %v1030_v1  ;;  %v797_v38 = vpack.c.bf16 %v376_v36, %v375_v35  ;;  %v800_v40 = vpack.c.bf16 %v378_v39, %v377_v37  ;;  %v379_v41 = vld [vmem:[#allocation10 + $0x20] sm:$0xff]  ;;  %v380_v42 = vld [vmem:[#allocation10 + $0x28] sm:$0xff]  ;;  %v381_v44 = vld [vmem:[#allocation10 + $0x30] sm:$0xff] }
  0x77   :  { %778 = vmatprep.subr.bf16.mxu0 %v1030_v1  ;;  %v803_v43 = vpack.c.bf16 %v380_v42, %v379_v41  ;;  %v382_v45 = vld [vmem:[#allocation10 + $0x38] sm:$0xff]  ;;  %v383_v47 = vld [vmem:[#allocation10 + $0x40] sm:$0xff]  ;;  %v384_v48 = vld [vmem:[#allocation10 + $0x48] sm:$0xff] }
  0x78   :  { %659 = vmatmul.mubr.msk.f32.vlgmr.msra.gmra.mrb[2].mxu1 %vm199_vm2, %v117_v18  ;;  %v806_v46 = vpack.c.bf16 %v382_v45, %v381_v44  ;;  %v809_v49 = vpack.c.bf16 %v384_v48, %v383_v47  ;;  %v385_v50 = vld [vmem:[#allocation10 + $0x50] sm:$0xff]  ;;  %v386_v51 = vld [vmem:[#allocation10 + $0x58] sm:$0xff]  ;;  %v387_v53 = vld [vmem:[#allocation10 + $0x60] sm:$0xff] }
  0x79   :  { %728 = vmatprep.mubr.msk.f32.mxu1 %vm1029_vm0, %v1028_v0  ;;  %798 = vmatpush3.bf16.msra.mxu1 %v797_v38  ;;  %v812_v52 = vpack.c.bf16 %v386_v51, %v385_v50  ;;  %v388_v54 = vld [vmem:[#allocation10 + $0x68] sm:$0xff]  ;;  %v583_v58 = vld [vmem:[%s1244_s4] ss:$0 sm:$0xff]  ;;  %v390_v3 = vld [vmem:[#allocation10 + $0x78] sm:$0xff] }
  0x7a   :  { %780 = vmatpush3.bf16.msra.mxu0 %v779_v19  ;;  %799 = vmatprep.subr.bf16.mxu1 %v1030_v1  ;;  %v815_v55 = vpack.c.bf16 %v388_v54, %v387_v53  ;;  %v389_v2 = vld [vmem:[#allocation10 + $0x70] sm:$0xff]  ;;  %v469_v5 = vld [vmem:[#allocation11] sm:$0xff]  ;;  %v470_v6 = vld [vmem:[#allocation11 + $0x8] sm:$0xff] }
  0x7b   :  { %781 = vmatprep.subr.bf16.mxu0 %v1030_v1  ;;  %v818_v4 = vpack.c.bf16 %v390_v3, %v389_v2  ;;  %v471_v7 = vld [vmem:[#allocation11 + $0x10] sm:$0xff]  ;;  %v821_v8 = vpack.c.bf16 %v470_v6, %v469_v5  ;;  %v472_v9 = vld [vmem:[#allocation11 + $0x18] sm:$0xff]  ;;  %v473_v11 = vld [vmem:[#allocation11 + $0x20] sm:$0xff] }
  0x7c   :  { %v824_v10 = vpack.c.bf16 %v472_v9, %v471_v7  ;;  %v474_v12 = vld [vmem:[#allocation11 + $0x28] sm:$0xff]  ;;  %v476_v14 = vld [vmem:[#allocation11 + $0x38] sm:$0xff]  ;;  %v477_v16 = vld [vmem:[#allocation11 + $0x40] sm:$0xff] }
  0x7d   :  { %801 = vmatpush3.bf16.msra.mxu1 %v800_v40  ;;  %v827_v13 = vpack.c.bf16 %v474_v12, %v473_v11  ;;  %v478_v17 = vld [vmem:[#allocation11 + $0x48] sm:$0xff]  ;;  %v479_v19 = vld [vmem:[#allocation11 + $0x50] sm:$0xff]  ;;  %v480_v20 = vld [vmem:[#allocation11 + $0x58] sm:$0xff] }
  0x7e   :  { %783 = vmatpush3.bf16.msra.mxu0 %v782_v22  ;;  %802 = vmatprep.subr.bf16.mxu1 %v1030_v1  ;;  %v833_v18 = vpack.c.bf16 %v478_v17, %v477_v16  ;;  %v836_v21 = vpack.c.bf16 %v480_v20, %v479_v19  ;;  %v481_v22 = vld [vmem:[#allocation11 + $0x60] sm:$0xff]  ;;  %v482_v23 = vld [vmem:[#allocation11 + $0x68] sm:$0xff]  ;;  %v483_v30 = vld [vmem:[#allocation11 + $0x70] sm:$0xff] }
  0x7f   :  { %784 = vmatprep.subr.bf16.mxu0 %v1030_v1  ;;  %v839_v24 = vpack.c.bf16 %v482_v23, %v481_v22  ;;  %v585_v33 = vld [vmem:[%s1248_s8] ss:$0 sm:$0xff] }
  0x80   :  { %v586_v37 = vld [vmem:[%s1250_s10] ss:$0 sm:$0xff] }
  0x81   :  { %804 = vmatpush3.bf16.msra.mxu1 %v803_v43 }
  0x82   :  { %786 = vmatpush3.bf16.msra.mxu0 %v785_v25  ;;  %805 = vmatprep.subr.bf16.mxu1 %v1030_v1  ;;  %v584_v25 = vld [vmem:[%s1246_s6] ss:$0 sm:$0xff] }
  0x83   :  { %787 = vmatprep.subr.bf16.mxu0 %v1030_v1 }
  0x85   :  { %807 = vmatpush3.bf16.msra.mxu1 %v806_v46 }
  0x86   :  { %789 = vmatpush3.bf16.msra.mxu0 %v788_v28  ;;  %808 = vmatprep.subr.bf16.mxu1 %v1030_v1 }
  0x87   :  { %790 = vmatprep.subr.bf16.mxu0 %v1030_v1 }
  0x89   :  { %810 = vmatpush3.bf16.msra.mxu1 %v809_v49 }
  0x8a   :  { %792 = vmatpush3.bf16.msra.mxu0 %v791_v31  ;;  %811 = vmatprep.subr.bf16.mxu1 %v1030_v1  ;;  %v484_v31 = vld [vmem:[#allocation11 + $0x78] sm:$0xff] }
  0x8b   :  { %793 = vmatprep.subr.bf16.mxu0 %v1030_v1  ;;  %v842_v32 = vpack.c.bf16 %v484_v31, %v483_v30 }
  0x8d   :  { %813 = vmatpush3.bf16.msra.mxu1 %v812_v52 }
  0x8e   :  { %795 = vmatpush3.bf16.msra.mxu0 %v794_v34  ;;  %814 = vmatprep.subr.bf16.mxu1 %v1030_v1 }
  0x8f   :  { %820 = vmatprep.subr.bf16.mxu0 %v1030_v1 }
  0x91   :  { %816 = vmatpush3.bf16.msra.mxu1 %v815_v55 }
  0x92   :  { %817 = vmatprep.subr.bf16.mxu1 %v1030_v1 }
  0x95   :  { %819 = vmatpush3.bf16.msra.mxu1 %v818_v4 }
 0x143   :  { %v195_v56 = vpop.f32.mrb[0].mxu1 }
 0x144   :  { %v649_v57 = vpop.f32.mrb[1].mxu1 }
 0x14b   :  { %v269_v59 = vpop.f32.mrb[2].mxu1 }
 0x14c   :  { %v270_v60 = vadd.f32 %v269_v59, %v195_v56  ;;  %v660_v61 = vpop.f32.mrb[3].mxu1 }
 0x14e   :  { %v279_v62 = vadd.f32 %v583_v58, %v270_v60 }
 0x150   :  { %v280_v63 = vmax.f32 %v279_v62, 0.0 }
 0x152   :  { %694 = vmatmul.mubr.f32.vlgmr.msra.gmra.mrb[0].mxu0 %v280_v63 }
 0x153   :  { %763 = vmatprep.mubr.msk.f32.mxu0 %vm1029_vm0, %v1028_v0  ;;  %822 = vmatpush3.bf16.msra.mxu0 %v821_v8  ;;  %v475_v0 = vld [vmem:[#allocation11 + $0x30] sm:$0xff] }
 0x154   :  { %823 = vmatprep.subr.bf16.mxu0 %v1030_v1  ;;  %v830_v15 = vpack.c.bf16 %v476_v14, %v475_v0 }
 0x157   :  { %825 = vmatpush3.bf16.msra.mxu0 %v824_v10 }
 0x158   :  { %826 = vmatprep.subr.bf16.mxu0 %v1030_v1 }
 0x15b   :  { %828 = vmatpush3.bf16.msra.mxu0 %v827_v13 }
 0x15c   :  { %829 = vmatprep.subr.bf16.mxu0 %v1030_v1 }
 0x15f   :  { %831 = vmatpush3.bf16.msra.mxu0 %v830_v15 }
 0x160   :  { %832 = vmatprep.subr.bf16.mxu0 %v1030_v1 }
 0x163   :  { %834 = vmatpush3.bf16.msra.mxu0 %v833_v18 }
 0x164   :  { %835 = vmatprep.subr.bf16.mxu0 %v1030_v1 }
 0x167   :  { %837 = vmatpush3.bf16.msra.mxu0 %v836_v21 }
 0x168   :  { %838 = vmatprep.subr.bf16.mxu0 %v1030_v1 }
 0x16b   :  { %840 = vmatpush3.bf16.msra.mxu0 %v839_v24 }
 0x16c   :  { %841 = vmatprep.subr.bf16.mxu0 %v1030_v1 }
 0x16f   :  { %843 = vmatpush3.bf16.msra.mxu0 %v842_v32 }
 0x225   :  { %v370_v26 = vpop.f32.mrb[0].mxu0 }
 0x226   :  { %v371_v27 = vadd.f32 %v584_v25, %v370_v26  ;;  %v695_v28 = vpop.f32.mrb[1].mxu0 }
 0x228   :  { %v374_v29 = vmax.f32 %v371_v27, 0.0 }
 0x22a   :  { %729 = vmatmul.mubr.f32.vlgmr.msra.gmra.mrb[4].mxu1 %v374_v29 }
 0x2fd   :  { %v464_v34 = vpop.f32.mrb[4].mxu1 }
 0x2fe   :  { %v465_v35 = vadd.f32 %v585_v33, %v464_v34  ;;  %v730_v1 = vpop.f32.mrb[5].mxu1 }
 0x300   :  { %v468_v36 = vmax.f32 %v465_v35, 0.0 }
 0x302   :  { %764 = vmatmul.mubr.f32.vlgmr.msra.gmra.mrb[2].mxu0 %v468_v36 }
 0x3d5   :  { %v558_v38 = vpop.f32.mrb[2].mxu0 }
 0x3d6   :  { %v559_v39 = vadd.f32 %v586_v37, %v558_v38  ;;  %v765_v40 = vpop.f32.mrb[3].mxu0 }
 0x3d8   :  { %562 = vst [vmem:[#allocation13] sm:$0xff] %v559_v39 }
 0x3d9   :  { %999 = shalt.err (!%p996_p10)
}
 0x3da   :  { %s1000_s2 = scalar_lea.hbm %s1251_s11, 128 }
 0x3db   :  { %p1001_p11 = scmp.ne.s32.totalorder %s1251_s11, %s1000_s2  ;;  %p1004_p12 = scmp.lt.u32.totalorder %s1000_s2, %s1251_s11 }
 0x3dd   :  { %p1006_p13 = pnand %p1004_p12, %p1001_p11 }
 0x3df   :  { %1009 = shalt.err (!%p1006_p13)
}
 0x3e0   :  { %572 = dma.vmem_to_hbm [thread:$0]  %s570_s30, 128, %s1251_s11, [#allocation4]  }
 0x3e1   :  { %1018 = dma.done.wait [#allocation4], 128  }
 0x3e2   :  { %1019 = vsyncadd [#allocation4], 4294967168 }
 0x3e3   :  { %576 = vsyncpa [#allocation3], 1 }
 0x3e4   :  { %577 = vsyncpa [#allocation6], 1 }
 0x3e5   :  { %578 = vsyncpa [#allocation9], 1 }
 0x3e6   :  { %579 = vsyncpa [#allocation12], 1 }
 0x3e7   :  { %580 = vsyncpa [#allocation4], 1 }

</bundles_post_ra>
